<compile_context>
chip_gen: v6e
topology: v6e:2x2x1
jax: 0.10.0
libtpu: 0.0.40
codegen_flags: <defaults>
</compile_context>

<pallas_src>
import jax
import jax.numpy as jnp
from jax.experimental import pallas as pl
from jax.experimental.pallas import tpu as pltpu

N = 16       # |D8| regular-representation dimension
FLAT = N * N  # 256 = flattened matrix width (2 full vregs of lanes)
TB_MAX = 512  # matrices per grid step for large batches (multiple of 8)


def _d8_regular_rep_kernel(x_ref, out_ref):
    """Builds TB 16x16 permutation matrices, flattened lane/sublane-dense.

    x_ref:   VMEM int32[TB, 1]   -- group element indices for this block
    out_ref: VMEM f32[TB, 256]   -- row-major-flattened (16,16) matrices
    """
    # Position-dependent terms, kept at (1, 256) and broadcast later.
    f = jax.lax.broadcasted_iota(jnp.int32, (1, FLAT), 1)   # flat idx k*16+j
    k = f >> 4                      # output group element (row of M)
    j = f & 15                      # input group element (column of M)
    j_is_refl = (j >= 8).astype(jnp.int32)                  # (1, 256)
    bj = j & 7                                              # (1, 256)

    # Per-x terms, (TB, 1) vectors.
    x = x_ref[...]                                          # (TB, 1) int32
    x_is_refl = (x >= 8).astype(jnp.int32)                  # (TB, 1)
    a = x - 8 * x_is_refl           # rotation exponent of x
    sign = 1 - 2 * x_is_refl        # +1 if x is a rotation, -1 if reflection

    # group_mult(x, j):
    #   rotation exponent of product: (a + sign*bj) & 7
    #   (two's-complement & 7 == floored mod 8, also for negative a - bj)
    #   reflection flag of product: x_refl XOR j_refl
    s = (a + sign * bj) & 7                                 # (TB, 256)
    refl = x_is_refl ^ j_is_refl                            # (TB, 256)
    prod = s + 8 * refl                                     # (TB, 256)

    out_ref[...] = (k == prod).astype(out_ref.dtype)


def d8_regular_representation(x_idx) -> jax.Array:
    """Pallas equivalent of D8RegularRepresentation.forward.

    Accepts a scalar index in [0, 16) (returns (16, 16)) or an int vector of
    indices (returns (B, 16, 16)); all matrices come from a single
    pallas_call. Behavior is only defined for indices in [0, 16).
    """
    was_scalar = jnp.ndim(x_idx) == 0
    x_arr = jnp.atleast_1d(jnp.asarray(x_idx, dtype=jnp.int32))
    B = x_arr.shape[0]

    # Block size: one step for small B (rounded up to a multiple of 8),
    # TB_MAX-matrix tiles (~0.5 MiB f32 per step) for large B.
    if B <= TB_MAX:
        TB = max(8, ((B + 7) // 8) * 8)
    else:
        TB = TB_MAX
    B_pad = ((B + TB - 1) // TB) * TB
    if B_pad != B:
        # Pad with VALID indices (0); padded rows are sliced off below.
        x_arr = jnp.concatenate(
            [x_arr, jnp.zeros((B_pad - B,), dtype=jnp.int32)])
    x2d = x_arr.reshape(B_pad, 1)

    out_flat = pl.pallas_call(
        _d8_regular_rep_kernel,
        out_shape=jax.ShapeDtypeStruct((B_pad, FLAT), jnp.float32),
        grid=(B_pad // TB,),
        in_specs=[pl.BlockSpec((TB, 1), lambda i: (i, 0))],
        out_specs=pl.BlockSpec((TB, FLAT), lambda i: (i, 0)),
        compiler_params=pltpu.CompilerParams(
            dimension_semantics=("parallel",)),  # v7x: split batch over 2 TCs
    )(x2d)

    out = out_flat[:B].reshape(B, N, N)   # free layout plumbing
    return out[0] if was_scalar else out


# ---------------- pure-Python reference (mirrors the PyTorch module) ---------
def _group_mult_ref(i, j):
    if i < 8 and j < 8:
        return (i + j) % 8
    elif i < 8 and j >= 8:
        return 8 + (i + (j - 8)) % 8
    elif i >= 8 and j < 8:
        return 8 + ((i - 8) - j) % 8
    else:
        return ((i - 8) - (j - 8)) % 8


def _reference_matrix(i):
    import numpy as np
    M = np.zeros((N, N), dtype=np.float32)
    for j in range(N):
        M[_group_mult_ref(i, j), j] = 1.0
    return M


if __name__ == "__main__":
    import numpy as np

    # Deterministic "inputs": a batch of group-element indices (this module
    # has no learned parameters).
    key = jax.random.PRNGKey(0)
    x_batch = jax.random.randint(key, (8,), 0, N, dtype=jnp.int32)

    out_batch = jax.block_until_ready(d8_regular_representation(x_batch))
    assert out_batch.shape == (8, N, N) and out_batch.dtype == jnp.float32
    for b, xi in enumerate(np.asarray(x_batch)):
        np.testing.assert_array_equal(np.asarray(out_batch[b]),
                                      _reference_matrix(int(xi)))

    # Exhaustive check: all 16 group elements in ONE batched call.
    all_out = jax.block_until_ready(d8_regular_representation(jnp.arange(N)))
    for i in range(N):
        np.testing.assert_array_equal(np.asarray(all_out[i]),
                                      _reference_matrix(i))

    # Larger batch that exercises the multi-step grid + padding path.
    big_idx = jax.random.randint(jax.random.PRNGKey(1), (1000,), 0, N,
                                 dtype=jnp.int32)
    big_out = jax.block_until_ready(d8_regular_representation(big_idx))
    assert big_out.shape == (1000, N, N)
    sample = np.random.default_rng(0).choice(1000, size=16, replace=False)
    for b in sample:
        np.testing.assert_array_equal(np.asarray(big_out[b]),
                                      _reference_matrix(int(big_idx[b])))

    # Scalar path still matches forward(x) -> (16, 16).
    single = jax.block_until_ready(d8_regular_representation(5))
    np.testing.assert_array_equal(np.asarray(single), _reference_matrix(5))

    print("KERNEL_OK")
</pallas_src>

<mosaic_0001>
module attributes {stable_mosaic.version = 11 : i64} {
  func.func @_d8_regular_rep_kernel(%arg0: i32, %arg1: memref<8x1xi32, #tpu.memory_space<vmem>>, %arg2: memref<8x256xf32, #tpu.memory_space<vmem>>) attributes {dimension_semantics = [#tpu.dimension_semantics<parallel>], iteration_bounds = array<i64: 1>, scalar_prefetch = 0 : i64, scratch_operands = 0 : i64, tpu.core_type = #tpu.core_type<tc>, window_params = [{transform_indices = @transform_0, window_bounds = array<i64: 8, 1>}, {transform_indices = @transform_1, window_bounds = array<i64: 8, 256>}]} {
    %0 = tpu.iota {dimensions = array<i32: 1>} : vector<1x256xi32>
    %c4_i32 = arith.constant 4 : i32
    %1 = vector.broadcast %c4_i32 : i32 to vector<1x256xi32>
    %2 = arith.shrsi %0, %1 : vector<1x256xi32>
    %c15_i32 = arith.constant 15 : i32
    %3 = vector.broadcast %c15_i32 : i32 to vector<1x256xi32>
    %4 = arith.andi %0, %3 : vector<1x256xi32>
    %c8_i32 = arith.constant 8 : i32
    %5 = vector.broadcast %c8_i32 : i32 to vector<1x256xi32>
    %6 = arith.cmpi sge, %4, %5 : vector<1x256xi32>
    %7 = arith.extui %6 : vector<1x256xi1> to vector<1x256xi32>
    %c7_i32 = arith.constant 7 : i32
    %8 = vector.broadcast %c7_i32 : i32 to vector<1x256xi32>
    %9 = arith.andi %4, %8 : vector<1x256xi32>
    %c0 = arith.constant 0 : index
    %c0_0 = arith.constant 0 : index
    %10 = vector.load %arg1[%c0, %c0_0] : memref<8x1xi32, #tpu.memory_space<vmem>>, vector<8x1xi32>
    %c8_i32_1 = arith.constant 8 : i32
    %11 = vector.broadcast %c8_i32_1 : i32 to vector<8x1xi32>
    %12 = arith.cmpi sge, %10, %11 : vector<8x1xi32>
    %13 = arith.extui %12 : vector<8x1xi1> to vector<8x1xi32>
    %c8_i32_2 = arith.constant 8 : i32
    %14 = vector.broadcast %c8_i32_2 : i32 to vector<8x1xi32>
    %15 = arith.muli %14, %13 : vector<8x1xi32>
    %16 = arith.subi %10, %15 : vector<8x1xi32>
    %c2_i32 = arith.constant 2 : i32
    %17 = vector.broadcast %c2_i32 : i32 to vector<8x1xi32>
    %18 = arith.muli %17, %13 : vector<8x1xi32>
    %c1_i32 = arith.constant 1 : i32
    %19 = vector.broadcast %c1_i32 : i32 to vector<8x1xi32>
    %20 = arith.subi %19, %18 : vector<8x1xi32>
    %21 = vector.broadcast %20 : vector<8x1xi32> to vector<8x256xi32>
    %22 = vector.broadcast %9 : vector<1x256xi32> to vector<8x256xi32>
    %23 = arith.muli %21, %22 : vector<8x256xi32>
    %24 = vector.broadcast %16 : vector<8x1xi32> to vector<8x256xi32>
    %25 = arith.addi %24, %23 : vector<8x256xi32>
    %c7_i32_3 = arith.constant 7 : i32
    %26 = vector.broadcast %c7_i32_3 : i32 to vector<8x256xi32>
    %27 = arith.andi %25, %26 : vector<8x256xi32>
    %28 = vector.broadcast %13 : vector<8x1xi32> to vector<8x256xi32>
    %29 = vector.broadcast %7 : vector<1x256xi32> to vector<8x256xi32>
    %30 = arith.xori %28, %29 : vector<8x256xi32>
    %c8_i32_4 = arith.constant 8 : i32
    %31 = vector.broadcast %c8_i32_4 : i32 to vector<8x256xi32>
    %32 = arith.muli %31, %30 : vector<8x256xi32>
    %33 = arith.addi %27, %32 : vector<8x256xi32>
    %34 = vector.broadcast %2 : vector<1x256xi32> to vector<8x256xi32>
    %35 = arith.cmpi eq, %34, %33 : vector<8x256xi32>
    %36 = arith.extui %35 : vector<8x256xi1> to vector<8x256xi32>
    %37 = arith.sitofp %36 : vector<8x256xi32> to vector<8x256xf32>
    %c0_5 = arith.constant 0 : index
    %c0_6 = arith.constant 0 : index
    %38 = vector.load %arg2[%c0_5, %c0_6] : memref<8x256xf32, #tpu.memory_space<vmem>>, vector<8x256xf32>
    tpu.vector_store %arg2[%c0_5, %c0_6], %37 {strides = array<i32>} : memref<8x256xf32, #tpu.memory_space<vmem>>, vector<8x256xf32>,
    return
  }
  func.func @transform_0(%arg0: i32) -> (i32, i32) {
    %c0_i32 = arith.constant 0 : i32
    %c0_i32_0 = arith.constant 0 : i32
    return %arg0, %c0_i32 : i32, i32
  }
  func.func @transform_1(%arg0: i32) -> (i32, i32) {
    %c0_i32 = arith.constant 0 : i32
    %c0_i32_0 = arith.constant 0 : i32
    return %arg0, %c0_i32 : i32, i32
  }
}

</mosaic_0001>

<bundles_post_ra>
// kernel: tpu_custom_call.1
= control target key start
LH: loop header
LB: loop body
LE: loop exit
PB: predicated region body
PF: predicated region fallthrough
CT: control target
= control target key end

     0   :  { %s120_s0 = inlined_call_operand.vmem [shape: s32[8,1], index: 0, kind: input, shape index: {}]   ;;  %s121_s1 = inlined_call_operand.hbm [shape: f32[8,256], index: 1, kind: output, shape index: {}]  }
   0x1   :  { %v22_v0 = vld [vmem:[%s120_s0] sm:$0xff] }
   0x2   :  { %6 = vsyncpa [#allocation3], 0  ;;  %v101_v1 = vmov 0   ;;  %vm23_vm0 = vcmp.ge.s32.totalorder %v22_v0, 8  ;;  %v9_v7 = vlaneseq  ;;  %s102_s0 = smov [#allocation2]   ;;  %v103_v33 = vmov 0.0  }
   0x3   :  { %77 = vset.pattern.permute.xlu0 %v101_v1  ;;  %78 = vset.pattern.permute.xlu1 %v101_v1  ;;  %v24_v2 = vsel %vm23_vm0, 1, %v101_v1  ;;  %s64_s8 = sshll.u32 %s102_s0, 4  ;;  %s65_s8 = int_to_ptr.vmem [resolvable:$true] %s64_s8 }
   0x4   :  { %v27_v3 = vmul.u32 2, %v24_v2  ;;  %42 = vperm.xlu1 %78, %v24_v2   ;;  %v25_v4 = vmul.u32 8, %v24_v2  ;;  %v10_v8 = vand.u32 127, %v9_v7  ;;  %s79_s9 = scalar_lea.vmem %s65_s8, 256  ;;  %p84_p1 = scmp.lt.s32.totalorder %s65_s8, %s65_s8 }
   0x5   :  { %p80_p0 = scmp.ne.s32.totalorder %s65_s8, %s79_s9  ;;  %p85_p2 = scmp.lt.s32.totalorder %s79_s9, %s79_s9 }
   0x6   :  { %v28_v5 = vsub.s32 1, %v27_v3  ;;  %v26_v6 = vsub.s32 %v22_v0, %v25_v4  ;;  %v11_v9 = vadd.s32 128, %v10_v8  ;;  %v14_v10 = vand.u32 15, %v10_v8 }
   0x7   :  { %v12_v29 = vshra.s32 %v10_v8, 4  ;;  %p86_p3 = por %p85_p2, %p84_p1 }
   0x8   :  { %30 = vperm.xlu0 %77, %v28_v5   ;;  %v15_v11 = vand.u32 15, %v11_v9  ;;  %vm16_vm1 = vcmp.ge.s32.totalorder %v14_v10, 8  ;;  %v20_v15 = vand.u32 7, %v14_v10  ;;  %v13_v30 = vshra.s32 %v11_v9, 4 }
   0x9   :  { %v18_v13 = vsel %vm16_vm1, 1, %v101_v1  ;;  %p87_p4 = pnand %p86_p3, %p80_p0 }
   0xa   :  { %vm17_vm2 = vcmp.ge.s32.totalorder %v15_v11, 8  ;;  %v21_v16 = vand.u32 7, %v15_v11 }
   0xb   :  { %v19_v14 = vsel %vm17_vm2, 1, %v101_v1 }
   0xc   :  { %35 = vperm.xlu0 %77, %v26_v6  }
  0x7f   :  { %v43_v12 = vpop.permute.xlu1 %42 }
  0x80   :  { %v44_v18 = vxor.u32 %v43_v12, %v18_v13  ;;  %v45_v19 = vxor.u32 %v43_v12, %v19_v14 }
  0x82   :  { %v46_v23 = vmul.u32 8, %v44_v18  ;;  %v47_v24 = vmul.u32 8, %v45_v19 }
  0x83   :  { %v31_v17 = vpop.permute.xlu0 %30 }
  0x84   :  { %v32_v20 = vmul.u32 %v31_v17, %v20_v15  ;;  %v33_v21 = vmul.u32 %v31_v17, %v21_v16 }
  0x87   :  { %v36_v22 = vpop.permute.xlu0 %35 }
  0x88   :  { %v37_v25 = vadd.s32 %v36_v22, %v32_v20  ;;  %v38_v26 = vadd.s32 %v36_v22, %v33_v21 }
  0x8a   :  { %v39_v27 = vand.u32 7, %v37_v25  ;;  %v40_v28 = vand.u32 7, %v38_v26 }
  0x8c   :  { %v48_v31 = vadd.s32 %v46_v23, %v39_v27  ;;  %v49_v32 = vadd.s32 %v47_v24, %v40_v28 }
  0x8e   :  { %vm50_vm3 = vcmp.eq.s32.totalorder %v12_v29, %v48_v31  ;;  %vm51_vm4 = vcmp.eq.s32.totalorder %v13_v30, %v49_v32 }
  0x8f   :  { %v72_v34 = vsel %vm50_vm3, 1.0, %v103_v33  ;;  %v73_v35 = vsel %vm51_vm4, 1.0, %v103_v33 }
  0x90   :  { %56 = vst [vmem:[#allocation2] sm:$0xff] %v72_v34  ;;  %57 = vst [vmem:[#allocation2 + $0x8] sm:$0xff] %v73_v35 }
  0x91   :  { %90 = shalt.err (!%p87_p4)
}
  0x92   :  { %67 = dma.vmem_to_hbm [thread:$0]  %s65_s8, 256, %s121_s1, [#allocation3]  }
  0x93   :  { %99 = dma.done.wait [#allocation3], 256  }
  0x94   :  { %100 = vsyncadd [#allocation3], 4294967040 }
  0x95   :  { %71 = vsyncpa [#allocation3], 1 }

</bundles_post_ra>
